<compile_context>
chip_gen: v5e
topology: v5e:2x2
jax: 0.10.0
libtpu: 0.0.40
codegen_flags: <defaults>
</compile_context>

<pallas_src>
import functools

import jax
import jax.numpy as jnp
from jax import lax
from jax.experimental import pallas as pl
from jax.experimental.pallas import tpu as pltpu


_LANE = 128
_SUB = 8


def _round_up(v, m):
    return ((v + m - 1) // m) * m


# -----------------------------------------------------------------------------
# Kernels
# -----------------------------------------------------------------------------
def _dcmac_gather_kernel(x_ref, seg_ref, o_ref, *, scale, offset, hi, sub=_SUB):
    """Gather path: o = seg[clamp(floor(x*scale + offset), 1, hi)].

    x_ref:   (R, C) f32 block, lane-dense.
    seg_ref: (1, 128) f32, resident in VMEM (padded segment-sum table).
    o_ref:   (R, C) f32 block.
    """
    seg = seg_ref[0]                          # (128,) -- loaded once per grid step
    hi_i = int(hi)
    n_slabs = x_ref.shape[0] // sub
    unroll = True if n_slabs <= 8 else 8

    def slab(s, carry):
        r0 = pl.multiple_of(s * sub, sub)
        x = x_ref[pl.ds(r0, sub), :]                        # (sub, C)
        prop = x * scale + offset
        prop = jnp.minimum(jnp.maximum(prop, 1.0), hi)      # clamp to [1, A-1]
        base = prop.astype(jnp.int32)                       # trunc == floor (prop >= 1)
        # Re-clamp the integer index: garbage rows of a partial tail block may
        # be NaN, whose int cast is undefined; keep every index in-bounds.
        base = jnp.minimum(jnp.maximum(base, 1), hi_i)
        o_ref[pl.ds(r0, sub), :] = jnp.take(seg, base, axis=0, mode="clip")
        return carry

    lax.fori_loop(0, n_slabs, slab, 0, unroll=unroll)


def _dcmac_select_kernel(x_ref, seg_ref, o_ref, *, num_assoc, scale, offset,
                         sub=_SUB):
    """Fallback path: threshold select chain (always lowerable on Mosaic).

    floor(prop) >= a  <=>  prop >= a  for integer a and prop >= 1, so the
    floor/int-cast and both clamps fold into the chain: acc starts at seg[1]
    (low clamp) and the final compare caps at seg[num_assoc-1] (high clamp).

    x_ref:   (R, C) f32 block.
    seg_ref: (num_assoc,) f32 in SMEM.
    o_ref:   (R, C) f32 block.
    """
    # Hoist all SMEM scalar reads out of the slab loop (once per grid step).
    seg1 = seg_ref[1]
    seg_rest = [seg_ref[a] for a in range(2, num_assoc)]
    n_slabs = x_ref.shape[0] // sub
    unroll = True if n_slabs <= 8 else 8

    def slab(s, carry):
        r0 = pl.multiple_of(s * sub, sub)
        x = x_ref[pl.ds(r0, sub), :]                        # (sub, C)
        prop = x * scale + offset
        acc = jnp.full(x.shape, seg1, dtype=jnp.float32)
        for a, sv in zip(range(2, num_assoc), seg_rest):
            acc = jnp.where(prop >= float(a), sv, acc)
        o_ref[pl.ds(r0, sub), :] = acc                      # lane-dense store
        return carry

    lax.fori_loop(0, n_slabs, slab, 0, unroll=unroll)


# -----------------------------------------------------------------------------
# pallas_call builder
# -----------------------------------------------------------------------------
def _make_call(kernel, rows, C, R, *, seg_in_smem):
    grid = pl.cdiv(rows, R)   # R need not divide rows; last block is masked
    seg_spec = (pl.BlockSpec(memory_space=pltpu.MemorySpace.SMEM)
                if seg_in_smem
                else pl.BlockSpec(memory_space=pltpu.MemorySpace.VMEM))
    return pl.pallas_call(
        kernel,
        out_shape=jax.ShapeDtypeStruct((rows, C), jnp.float32),
        grid_spec=pltpu.PrefetchScalarGridSpec(
            num_scalar_prefetch=0,
            grid=(grid,),
            in_specs=[
                pl.BlockSpec((R, C), lambda i: (i, 0)),     # x tile (pipelined)
                seg_spec,                                    # tiny resident table
            ],
            out_specs=pl.BlockSpec((R, C), lambda i: (i, 0)),
        ),
        compiler_params=pltpu.CompilerParams(
            dimension_semantics=("parallel",)),
    )


# -----------------------------------------------------------------------------
# Gather-support probe (compiles + validates a tiny instance once per C)
# -----------------------------------------------------------------------------
_GATHER_OK = {}


def _gather_supported(C):
    ok = _GATHER_OK.get(C)
    if ok is not None:
        return ok
    try:
        num_assoc = 13
        scale = float(num_assoc - 2) / 2.0
        offset = 1.0 - scale * (-1.0)
        hi = float(num_assoc - 1)
        xp = jax.random.uniform(jax.random.PRNGKey(123), (_SUB, C),
                                jnp.float32, minval=-1.5, maxval=1.5)
        segp = jnp.arange(_LANE, dtype=jnp.float32) * 0.5 + 1.0
        kern = functools.partial(_dcmac_gather_kernel, scale=scale,
                                 offset=offset, hi=hi)
        y = _make_call(kern, _SUB, C, _SUB, seg_in_smem=False)(
            xp, segp.reshape(1, _LANE))
        y = jax.block_until_ready(y)
        prop = jnp.clip(xp * scale + offset, 1.0, hi)
        want = segp[jnp.floor(prop).astype(jnp.int32)]
        ok = bool(jnp.allclose(y, want, atol=1e-6, rtol=1e-6))
    except Exception:
        ok = False
    _GATHER_OK[C] = ok
    return ok


# -----------------------------------------------------------------------------
# Public wrapper
# -----------------------------------------------------------------------------
def dcmac_forward(x, weight_vec, *, gen_factor, num_weights, input_min,
                  input_max, block_rows=512, lanes=1024, force_impl=None):
    """Pallas TPU implementation of DCMAC.forward for a flat f32 vector x (N,)."""
    x = jnp.asarray(x, jnp.float32)
    weight_vec = jnp.asarray(weight_vec, jnp.float32)
    n = x.shape[0]

    num_assoc = num_weights + 1 - gen_factor
    assert num_assoc >= 2, "gen_factor too large (num_assoc must be >= 2)"
    assert float(input_max) != float(input_min), "input_max == input_min"

    # Fold the affine index map into two compile-time scalars (kept identical
    # between kernel and reference so floor boundaries match exactly).
    scale = float(num_assoc - 2) / (float(input_max) - float(input_min))
    offset = 1.0 - scale * float(input_min)
    hi = float(num_assoc - 1)

    # Precompute the gen_factor segment sums (tiny: num_assoc x gen_factor).
    idx = (jnp.arange(num_assoc, dtype=jnp.int32)[:, None]
           + jnp.arange(gen_factor, dtype=jnp.int32)[None, :])
    seg = jnp.sum(weight_vec[idx], axis=1)                   # (num_assoc,)

    # ---- tiling: lane-dense, (8,128)-aligned blocks --------------------------
    C = max(_LANE, (int(lanes) // _LANE) * _LANE)
    while C > _LANE and C * _SUB > n:                        # avoid silly padding
        C //= 2
    rows = pl.cdiv(n, C)

    # Fast path: no wrapper pad / final slice when x reshapes cleanly into
    # sublane-aligned tiles; otherwise a single pad + final slice.
    if n == rows * C and rows % _SUB == 0:
        x2 = x.reshape(rows, C)
        ragged = False
    else:
        rows = _round_up(rows, _SUB)
        x2 = jnp.pad(x, (0, rows * C - n)).reshape(rows, C)
        ragged = True
        # TODO(synk): push the ragged tail into the kernel (masked final store
        # keyed off an SMEM scalar) to drop this pad/slice pass entirely.

    # Block rows: <= block_rows (2 MiB blocks at C=1024 -> 8 MiB double-buffered
    # in+out, within every generation's scoped-VMEM default), shrunk for small
    # inputs so the grid has several steps (v7x megacore sharding needs >= 2).
    R = min(_round_up(int(block_rows), _SUB),
            max(_SUB, _round_up(pl.cdiv(rows, 8), _SUB)))

    impl = force_impl
    if impl is None:
        impl = ("gather" if (num_assoc <= _LANE and _gather_supported(C))
                else "select")

    if impl == "gather":
        seg_pad = jnp.zeros((1, _LANE), jnp.float32).at[0, :num_assoc].set(seg)
        kern = functools.partial(_dcmac_gather_kernel, scale=scale,
                                 offset=offset, hi=hi)
        out2 = _make_call(kern, rows, C, R, seg_in_smem=False)(x2, seg_pad)
    else:
        kern = functools.partial(_dcmac_select_kernel, num_assoc=num_assoc,
                                 scale=scale, offset=offset)
        out2 = _make_call(kern, rows, C, R, seg_in_smem=True)(x2, seg)

    out = out2.reshape(rows * C)
    return out[:n] if ragged else out


def dcmac_reference(x, weight_vec, *, gen_factor, num_weights, input_min,
                    input_max):
    """Pure-JAX reference mirroring the PyTorch forward (with a real gather)."""
    num_assoc = num_weights + 1 - gen_factor
    scale = float(num_assoc - 2) / (float(input_max) - float(input_min))
    offset = 1.0 - scale * float(input_min)
    prop = x * scale + offset
    prop = jnp.minimum(jnp.maximum(prop, 1.0), float(num_assoc - 1))
    base = jnp.floor(prop).astype(jnp.int32)                  # (N,)
    idx = base[:, None] + jnp.arange(gen_factor, dtype=jnp.int32)[None, :]
    return jnp.sum(weight_vec[idx], axis=1)


if __name__ == "__main__":
    gen_factor = 4
    num_weights = 32
    input_min = -1.0
    input_max = 1.0

    key = jax.random.PRNGKey(0)
    kx, kw, kx2 = jax.random.split(key, 3)

    # inputs deliberately exceed [input_min, input_max] to exercise the clamps;
    # random weights so the gather+sum path is actually verified.
    weight_vec = jax.random.normal(kw, (num_weights,), jnp.float32)

    common = dict(gen_factor=gen_factor, num_weights=num_weights,
                  input_min=input_min, input_max=input_max)

    # 1) ragged size: exercises pad + tail slice and a 2-step grid
    n = 10000
    x = jax.random.uniform(kx, (n,), jnp.float32, minval=-1.3, maxval=1.3)
    y_ref = dcmac_reference(x, weight_vec, **common)
    y = jax.block_until_ready(dcmac_forward(x, weight_vec, **common))
    assert y.shape == (n,) and y.dtype == jnp.float32
    assert jnp.allclose(y, y_ref, atol=1e-5, rtol=1e-5), "mismatch (ragged)"

    # 2) fast path: no pad / no slice (n divisible by C=1024, rows % 8 == 0)
    n2 = 8 * 1024 * 3
    xf = jax.random.uniform(kx2, (n2,), jnp.float32, minval=-1.3, maxval=1.3)
    y2_ref = dcmac_reference(xf, weight_vec, **common)
    y2 = jax.block_until_ready(dcmac_forward(xf, weight_vec, **common))
    assert jnp.allclose(y2, y2_ref, atol=1e-5, rtol=1e-5), "mismatch (fast path)"

    # 3) forced fallback select-chain kernel, small tiles / multi-step grid
    y3 = jax.block_until_ready(dcmac_forward(
        x, weight_vec, **common, block_rows=8, lanes=256, force_impl="select"))
    assert jnp.allclose(y3, y_ref, atol=1e-5, rtol=1e-5), "mismatch (select path)"

    # 4) faithful ones-initialized parameter: output == gen_factor everywhere
    y4 = jax.block_until_ready(dcmac_forward(
        x, jnp.ones((num_weights,), jnp.float32), **common))
    assert jnp.allclose(y4, float(gen_factor)), "mismatch (ones weights)"

    print("KERNEL_OK")
</pallas_src>

<mosaic_0001>
module attributes {stable_mosaic.version = 11 : i64} {
  func.func @_dcmac_select_kernel(%arg0: i32, %arg1: memref<8x1024xf32, #tpu.memory_space<vmem>>, %arg2: memref<29xf32, #tpu.memory_space<smem>>, %arg3: memref<8x1024xf32, #tpu.memory_space<vmem>>) attributes {dimension_semantics = [#tpu.dimension_semantics<parallel>], iteration_bounds = array<i64: 2>, scalar_prefetch = 0 : i64, scratch_operands = 0 : i64, tpu.core_type = #tpu.core_type<tc>, window_params = [{transform_indices = @transform_0, window_bounds = array<i64: 8, 1024>}, {transform_indices = @transform_1, window_bounds = array<i64: 29>}, {transform_indices = @transform_2, window_bounds = array<i64: 8, 1024>}]} {
    %c1 = arith.constant 1 : index
    %0 = memref.load %arg2[%c1] : memref<29xf32, #tpu.memory_space<smem>>
    %c2 = arith.constant 2 : index
    %1 = memref.load %arg2[%c2] : memref<29xf32, #tpu.memory_space<smem>>
    %c3 = arith.constant 3 : index
    %2 = memref.load %arg2[%c3] : memref<29xf32, #tpu.memory_space<smem>>
    %c4 = arith.constant 4 : index
    %3 = memref.load %arg2[%c4] : memref<29xf32, #tpu.memory_space<smem>>
    %c5 = arith.constant 5 : index
    %4 = memref.load %arg2[%c5] : memref<29xf32, #tpu.memory_space<smem>>
    %c6 = arith.constant 6 : index
    %5 = memref.load %arg2[%c6] : memref<29xf32, #tpu.memory_space<smem>>
    %c7 = arith.constant 7 : index
    %6 = memref.load %arg2[%c7] : memref<29xf32, #tpu.memory_space<smem>>
    %c8 = arith.constant 8 : index
    %7 = memref.load %arg2[%c8] : memref<29xf32, #tpu.memory_space<smem>>
    %c9 = arith.constant 9 : index
    %8 = memref.load %arg2[%c9] : memref<29xf32, #tpu.memory_space<smem>>
    %c10 = arith.constant 10 : index
    %9 = memref.load %arg2[%c10] : memref<29xf32, #tpu.memory_space<smem>>
    %c11 = arith.constant 11 : index
    %10 = memref.load %arg2[%c11] : memref<29xf32, #tpu.memory_space<smem>>
    %c12 = arith.constant 12 : index
    %11 = memref.load %arg2[%c12] : memref<29xf32, #tpu.memory_space<smem>>
    %c13 = arith.constant 13 : index
    %12 = memref.load %arg2[%c13] : memref<29xf32, #tpu.memory_space<smem>>
    %c14 = arith.constant 14 : index
    %13 = memref.load %arg2[%c14] : memref<29xf32, #tpu.memory_space<smem>>
    %c15 = arith.constant 15 : index
    %14 = memref.load %arg2[%c15] : memref<29xf32, #tpu.memory_space<smem>>
    %c16 = arith.constant 16 : index
    %15 = memref.load %arg2[%c16] : memref<29xf32, #tpu.memory_space<smem>>
    %c17 = arith.constant 17 : index
    %16 = memref.load %arg2[%c17] : memref<29xf32, #tpu.memory_space<smem>>
    %c18 = arith.constant 18 : index
    %17 = memref.load %arg2[%c18] : memref<29xf32, #tpu.memory_space<smem>>
    %c19 = arith.constant 19 : index
    %18 = memref.load %arg2[%c19] : memref<29xf32, #tpu.memory_space<smem>>
    %c20 = arith.constant 20 : index
    %19 = memref.load %arg2[%c20] : memref<29xf32, #tpu.memory_space<smem>>
    %c21 = arith.constant 21 : index
    %20 = memref.load %arg2[%c21] : memref<29xf32, #tpu.memory_space<smem>>
    %c22 = arith.constant 22 : index
    %21 = memref.load %arg2[%c22] : memref<29xf32, #tpu.memory_space<smem>>
    %c23 = arith.constant 23 : index
    %22 = memref.load %arg2[%c23] : memref<29xf32, #tpu.memory_space<smem>>
    %c24 = arith.constant 24 : index
    %23 = memref.load %arg2[%c24] : memref<29xf32, #tpu.memory_space<smem>>
    %c25 = arith.constant 25 : index
    %24 = memref.load %arg2[%c25] : memref<29xf32, #tpu.memory_space<smem>>
    %c26 = arith.constant 26 : index
    %25 = memref.load %arg2[%c26] : memref<29xf32, #tpu.memory_space<smem>>
    %c27 = arith.constant 27 : index
    %26 = memref.load %arg2[%c27] : memref<29xf32, #tpu.memory_space<smem>>
    %c28 = arith.constant 28 : index
    %27 = memref.load %arg2[%c28] : memref<29xf32, #tpu.memory_space<smem>>
    %c0_i32 = arith.constant 0 : i32
    %c8_i32 = arith.constant 8 : i32
    %28 = arith.muli %c0_i32, %c8_i32 : i32
    %29 = tpu.assume_multiple %28, 8 : i32
    %30 = arith.index_cast %29 : i32 to index
    %c0 = arith.constant 0 : index
    %31 = vector.load %arg1[%30, %c0] : memref<8x1024xf32, #tpu.memory_space<vmem>>, vector<8x1024xf32>
    %cst = arith.constant 1.350000e+01 : f32
    %32 = vector.broadcast %cst : f32 to vector<8x1024xf32>
    %33 = arith.mulf %31, %32 : vector<8x1024xf32>
    %cst_0 = arith.constant 1.450000e+01 : f32
    %34 = vector.broadcast %cst_0 : f32 to vector<8x1024xf32>
    %35 = arith.addf %33, %34 : vector<8x1024xf32>
    %36 = vector.broadcast %0 : f32 to vector<8x1024xf32>
    %cst_1 = arith.constant 2.000000e+00 : f32
    %37 = vector.broadcast %cst_1 : f32 to vector<8x1024xf32>
    %38 = arith.cmpf oge, %35, %37 : vector<8x1024xf32>
    %39 = vector.broadcast %1 : f32 to vector<8x1024xf32>
    %40 = arith.select %38, %39, %36 : vector<8x1024xi1>, vector<8x1024xf32>
    %cst_2 = arith.constant 3.000000e+00 : f32
    %41 = vector.broadcast %cst_2 : f32 to vector<8x1024xf32>
    %42 = arith.cmpf oge, %35, %41 : vector<8x1024xf32>
    %43 = vector.broadcast %2 : f32 to vector<8x1024xf32>
    %44 = arith.select %42, %43, %40 : vector<8x1024xi1>, vector<8x1024xf32>
    %cst_3 = arith.constant 4.000000e+00 : f32
    %45 = vector.broadcast %cst_3 : f32 to vector<8x1024xf32>
    %46 = arith.cmpf oge, %35, %45 : vector<8x1024xf32>
    %47 = vector.broadcast %3 : f32 to vector<8x1024xf32>
    %48 = arith.select %46, %47, %44 : vector<8x1024xi1>, vector<8x1024xf32>
    %cst_4 = arith.constant 5.000000e+00 : f32
    %49 = vector.broadcast %cst_4 : f32 to vector<8x1024xf32>
    %50 = arith.cmpf oge, %35, %49 : vector<8x1024xf32>
    %51 = vector.broadcast %4 : f32 to vector<8x1024xf32>
    %52 = arith.select %50, %51, %48 : vector<8x1024xi1>, vector<8x1024xf32>
    %cst_5 = arith.constant 6.000000e+00 : f32
    %53 = vector.broadcast %cst_5 : f32 to vector<8x1024xf32>
    %54 = arith.cmpf oge, %35, %53 : vector<8x1024xf32>
    %55 = vector.broadcast %5 : f32 to vector<8x1024xf32>
    %56 = arith.select %54, %55, %52 : vector<8x1024xi1>, vector<8x1024xf32>
    %cst_6 = arith.constant 7.000000e+00 : f32
    %57 = vector.broadcast %cst_6 : f32 to vector<8x1024xf32>
    %58 = arith.cmpf oge, %35, %57 : vector<8x1024xf32>
    %59 = vector.broadcast %6 : f32 to vector<8x1024xf32>
    %60 = arith.select %58, %59, %56 : vector<8x1024xi1>, vector<8x1024xf32>
    %cst_7 = arith.constant 8.000000e+00 : f32
    %61 = vector.broadcast %cst_7 : f32 to vector<8x1024xf32>
    %62 = arith.cmpf oge, %35, %61 : vector<8x1024xf32>
    %63 = vector.broadcast %7 : f32 to vector<8x1024xf32>
    %64 = arith.select %62, %63, %60 : vector<8x1024xi1>, vector<8x1024xf32>
    %cst_8 = arith.constant 9.000000e+00 : f32
    %65 = vector.broadcast %cst_8 : f32 to vector<8x1024xf32>
    %66 = arith.cmpf oge, %35, %65 : vector<8x1024xf32>
    %67 = vector.broadcast %8 : f32 to vector<8x1024xf32>
    %68 = arith.select %66, %67, %64 : vector<8x1024xi1>, vector<8x1024xf32>
    %cst_9 = arith.constant 1.000000e+01 : f32
    %69 = vector.broadcast %cst_9 : f32 to vector<8x1024xf32>
    %70 = arith.cmpf oge, %35, %69 : vector<8x1024xf32>
    %71 = vector.broadcast %9 : f32 to vector<8x1024xf32>
    %72 = arith.select %70, %71, %68 : vector<8x1024xi1>, vector<8x1024xf32>
    %cst_10 = arith.constant 1.100000e+01 : f32
    %73 = vector.broadcast %cst_10 : f32 to vector<8x1024xf32>
    %74 = arith.cmpf oge, %35, %73 : vector<8x1024xf32>
    %75 = vector.broadcast %10 : f32 to vector<8x1024xf32>
    %76 = arith.select %74, %75, %72 : vector<8x1024xi1>, vector<8x1024xf32>
    %cst_11 = arith.constant 1.200000e+01 : f32
    %77 = vector.broadcast %cst_11 : f32 to vector<8x1024xf32>
    %78 = arith.cmpf oge, %35, %77 : vector<8x1024xf32>
    %79 = vector.broadcast %11 : f32 to vector<8x1024xf32>
    %80 = arith.select %78, %79, %76 : vector<8x1024xi1>, vector<8x1024xf32>
    %cst_12 = arith.constant 1.300000e+01 : f32
    %81 = vector.broadcast %cst_12 : f32 to vector<8x1024xf32>
    %82 = arith.cmpf oge, %35, %81 : vector<8x1024xf32>
    %83 = vector.broadcast %12 : f32 to vector<8x1024xf32>
    %84 = arith.select %82, %83, %80 : vector<8x1024xi1>, vector<8x1024xf32>
    %cst_13 = arith.constant 1.400000e+01 : f32
    %85 = vector.broadcast %cst_13 : f32 to vector<8x1024xf32>
    %86 = arith.cmpf oge, %35, %85 : vector<8x1024xf32>
    %87 = vector.broadcast %13 : f32 to vector<8x1024xf32>
    %88 = arith.select %86, %87, %84 : vector<8x1024xi1>, vector<8x1024xf32>
    %cst_14 = arith.constant 1.500000e+01 : f32
    %89 = vector.broadcast %cst_14 : f32 to vector<8x1024xf32>
    %90 = arith.cmpf oge, %35, %89 : vector<8x1024xf32>
    %91 = vector.broadcast %14 : f32 to vector<8x1024xf32>
    %92 = arith.select %90, %91, %88 : vector<8x1024xi1>, vector<8x1024xf32>
    %cst_15 = arith.constant 1.600000e+01 : f32
    %93 = vector.broadcast %cst_15 : f32 to vector<8x1024xf32>
    %94 = arith.cmpf oge, %35, %93 : vector<8x1024xf32>
    %95 = vector.broadcast %15 : f32 to vector<8x1024xf32>
    %96 = arith.select %94, %95, %92 : vector<8x1024xi1>, vector<8x1024xf32>
    %cst_16 = arith.constant 1.700000e+01 : f32
    %97 = vector.broadcast %cst_16 : f32 to vector<8x1024xf32>
    %98 = arith.cmpf oge, %35, %97 : vector<8x1024xf32>
    %99 = vector.broadcast %16 : f32 to vector<8x1024xf32>
    %100 = arith.select %98, %99, %96 : vector<8x1024xi1>, vector<8x1024xf32>
    %cst_17 = arith.constant 1.800000e+01 : f32
    %101 = vector.broadcast %cst_17 : f32 to vector<8x1024xf32>
    %102 = arith.cmpf oge, %35, %101 : vector<8x1024xf32>
    %103 = vector.broadcast %17 : f32 to vector<8x1024xf32>
    %104 = arith.select %102, %103, %100 : vector<8x1024xi1>, vector<8x1024xf32>
    %cst_18 = arith.constant 1.900000e+01 : f32
    %105 = vector.broadcast %cst_18 : f32 to vector<8x1024xf32>
    %106 = arith.cmpf oge, %35, %105 : vector<8x1024xf32>
    %107 = vector.broadcast %18 : f32 to vector<8x1024xf32>
    %108 = arith.select %106, %107, %104 : vector<8x1024xi1>, vector<8x1024xf32>
    %cst_19 = arith.constant 2.000000e+01 : f32
    %109 = vector.broadcast %cst_19 : f32 to vector<8x1024xf32>
    %110 = arith.cmpf oge, %35, %109 : vector<8x1024xf32>
    %111 = vector.broadcast %19 : f32 to vector<8x1024xf32>
    %112 = arith.select %110, %111, %108 : vector<8x1024xi1>, vector<8x1024xf32>
    %cst_20 = arith.constant 2.100000e+01 : f32
    %113 = vector.broadcast %cst_20 : f32 to vector<8x1024xf32>
    %114 = arith.cmpf oge, %35, %113 : vector<8x1024xf32>
    %115 = vector.broadcast %20 : f32 to vector<8x1024xf32>
    %116 = arith.select %114, %115, %112 : vector<8x1024xi1>, vector<8x1024xf32>
    %cst_21 = arith.constant 2.200000e+01 : f32
    %117 = vector.broadcast %cst_21 : f32 to vector<8x1024xf32>
    %118 = arith.cmpf oge, %35, %117 : vector<8x1024xf32>
    %119 = vector.broadcast %21 : f32 to vector<8x1024xf32>
    %120 = arith.select %118, %119, %116 : vector<8x1024xi1>, vector<8x1024xf32>
    %cst_22 = arith.constant 2.300000e+01 : f32
    %121 = vector.broadcast %cst_22 : f32 to vector<8x1024xf32>
    %122 = arith.cmpf oge, %35, %121 : vector<8x1024xf32>
    %123 = vector.broadcast %22 : f32 to vector<8x1024xf32>
    %124 = arith.select %122, %123, %120 : vector<8x1024xi1>, vector<8x1024xf32>
    %cst_23 = arith.constant 2.400000e+01 : f32
    %125 = vector.broadcast %cst_23 : f32 to vector<8x1024xf32>
    %126 = arith.cmpf oge, %35, %125 : vector<8x1024xf32>
    %127 = vector.broadcast %23 : f32 to vector<8x1024xf32>
    %128 = arith.select %126, %127, %124 : vector<8x1024xi1>, vector<8x1024xf32>
    %cst_24 = arith.constant 2.500000e+01 : f32
    %129 = vector.broadcast %cst_24 : f32 to vector<8x1024xf32>
    %130 = arith.cmpf oge, %35, %129 : vector<8x1024xf32>
    %131 = vector.broadcast %24 : f32 to vector<8x1024xf32>
    %132 = arith.select %130, %131, %128 : vector<8x1024xi1>, vector<8x1024xf32>
    %cst_25 = arith.constant 2.600000e+01 : f32
    %133 = vector.broadcast %cst_25 : f32 to vector<8x1024xf32>
    %134 = arith.cmpf oge, %35, %133 : vector<8x1024xf32>
    %135 = vector.broadcast %25 : f32 to vector<8x1024xf32>
    %136 = arith.select %134, %135, %132 : vector<8x1024xi1>, vector<8x1024xf32>
    %cst_26 = arith.constant 2.700000e+01 : f32
    %137 = vector.broadcast %cst_26 : f32 to vector<8x1024xf32>
    %138 = arith.cmpf oge, %35, %137 : vector<8x1024xf32>
    %139 = vector.broadcast %26 : f32 to vector<8x1024xf32>
    %140 = arith.select %138, %139, %136 : vector<8x1024xi1>, vector<8x1024xf32>
    %cst_27 = arith.constant 2.800000e+01 : f32
    %141 = vector.broadcast %cst_27 : f32 to vector<8x1024xf32>
    %142 = arith.cmpf oge, %35, %141 : vector<8x1024xf32>
    %143 = vector.broadcast %27 : f32 to vector<8x1024xf32>
    %144 = arith.select %142, %143, %140 : vector<8x1024xi1>, vector<8x1024xf32>
    %145 = arith.index_cast %29 : i32 to index
    %c0_28 = arith.constant 0 : index
    %146 = vector.load %arg3[%145, %c0_28] : memref<8x1024xf32, #tpu.memory_space<vmem>>, vector<8x1024xf32>
    tpu.vector_store %arg3[%145, %c0_28], %144 {strides = array<i32>} : memref<8x1024xf32, #tpu.memory_space<vmem>>, vector<8x1024xf32>,
    %c1_i32 = arith.constant 1 : i32
    return
  }
  func.func @transform_0(%arg0: i32) -> (i32, i32) {
    %c0_i32 = arith.constant 0 : i32
    %c0_i32_0 = arith.constant 0 : i32
    return %arg0, %c0_i32 : i32, i32
  }
  func.func @transform_1(%arg0: i32) -> i32 {
    %c0_i32 = arith.constant 0 : i32
    %c0_i32_0 = arith.constant 0 : i32
    return %c0_i32 : i32
  }
  func.func @transform_2(%arg0: i32) -> (i32, i32) {
    %c0_i32 = arith.constant 0 : i32
    %c0_i32_0 = arith.constant 0 : i32
    return %arg0, %c0_i32 : i32, i32
  }
}

</mosaic_0001>

<bundles_post_ra>
// kernel: tpu_custom_call.1
= control target key start
LH: loop header
LB: loop body
LE: loop exit
PB: predicated region body
PF: predicated region fallthrough
CT: control target
= control target key end

     0   :  { %7 = vsyncpa [#allocation3], 0  ;;  %s1909_s0 = inlined_call_operand.hbm [shape: f32[16,1024], index: 0, kind: input, shape index: {}]   ;;  %s1910_s1 = inlined_call_operand.hbm [shape: f32[29], index: 1, kind: input, shape index: {}]   ;;  %s1911_s2 = inlined_call_operand.hbm [shape: f32[16,1024], index: 2, kind: output, shape index: {}]  }
   0x1   :  { %9 = vsyncpa [#allocation3 + $0x1], 0 }
   0x2   :  { %10 = vsyncpa [#allocation5], 0 }
   0x3   :  { %11 = vsyncpa [#allocation4], 0 }
   0x4   :  { %13 = vsyncpa [#allocation4 + $0x1], 0  ;;  %s1036_s9 = smov 0   ;;  %s1038_s10 = smov 0  }
   0x5   :  { %s1040_s11 = smov 0   ;;  %s1042_s12 = smov 0  }
   0x6 LB: > { %s1057_s13 = sadd.s32 4294967295, %s1018_s12   ;;  %s800_s14 = sadd.s32 4294967294, %s1018_s12   ;;  %s1018_s12 = sphi %s1042_s12, %s1921_s12   ;;  %s1014_s11 = sphi %s1040_s11, %s1920_s11   ;;  %s1010_s10 = sphi %s1038_s10, %s1919_s10   ;;  %s1006_s9 = sphi %s1036_s9, %s1918_s9  }
   0x7   : > { %p39_p0 = scmp.ne.s32.totalorder %s1010_s10, %s1006_s9  ;;  %p40_p1 = scmp.eq.s32.totalorder %s1057_s13, 0 }
   0x8   : > { %p84_p2 = scmp.eq.s32.totalorder %s1057_s13, 1  ;;  %p90_p3 = scmp.eq.s32.totalorder %s800_s14, 1 }
   0x9   : > { %p1066_p4 = por %p40_p1, %p39_p0  ;;  %p801_p5 = scmp.ge.s32.totalorder %s1018_s12, 1 }
   0xa   : > { %p1071_p6 = por %p90_p3, %p39_p0  ;;  %p97_p7 = scmp.lt.s32.totalorder %s1018_s12, 3 }
   0xb   : > { %s109_s19 = sshll.u32 %s1910_s1, 4  ;;  %s1087_s21 = sadd.s32 1, %s1018_s12   ;;  %s110_s19 = int_to_ptr.hbm [resolvable:$true] %s109_s19 }
   0xc   : > { %p1079_p8 = pnand %p801_p5, %p97_p7  ;;  %s23_s22 = ssub.s32 %s1018_s12, %s1087_s21 }
   0xd   : > { %p24_p12 = scmp.eq.s32.totalorder %s23_s22, 0  ;;  %s26_s23 = sadd.s32 1, %s1014_s11 }
   0xe   : > { %p854_p10 = pneg %p1079_p8  ;;  %p33_p13 = scmp.ne.s32.totalorder %s1014_s11, %s1010_s10 }
   0xf   : > { %s1020_s24 = smov [#allocation6]   ;;  %p34_p0 = scmp.eq.s32.totalorder %s1018_s12, 0 }
  0x10   : > { %p855_p11 = pnand %p854_p10, %p40_p1  ;;  %p1102_p3 = por %p84_p2, %p33_p13 }
  0x11   : > { %s1097_s25 = scalar_select %p24_p12, %s1014_s11, %s26_s23  }
  0x12   : > { %857 = dma.hbm_to_smem (!%p855_p11), %s110_s19, 16, %s1020_s24, [#allocation5]  }
  0x13   : > { %s120_s27 = sand.u32 1, %s1014_s11   ;;  %p35_p5 = por %p34_p0, %p33_p13 }
  0x14   : > { %p867_p7 = scmp.lt.s32.totalorder %s1018_s12, 2  ;;  %s804_s28 = sshll.u32 %s120_s27, 6 }
  0x15   : > { %s844_s29 = sshll.u32 %s1018_s12, 6  ;;  %s124_s6 = scalar_lea.vmem [#allocation2], %s804_s28 }
  0x16   : > { %s129_s4 = scalar_lea.hbm %s1909_s0, %s844_s29  ;;  %s133_s7 = sshll.u32 %s124_s6, 4  ;;  %s134_s7 = int_to_ptr.vmem [resolvable:$true] %s133_s7 }
  0x17   : > { %s131_s5 = sshll.u32 %s129_s4, 4  ;;  %p1112_p10 = pnand %p867_p7, %p35_p5  ;;  %s132_s5 = int_to_ptr.hbm [resolvable:$true] %s131_s5 }
  0x18   : > { %s121_s14 = scalar_lea.sflag [#allocation3], %s120_s27  ;;  %s918_s17 = sshra.s32 %s132_s5, 4  ;;  %s919_s17 = int_to_ptr.hbm [resolvable:$true] %s918_s17 }
  0x19   : > { %s920_s18 = scalar_lea.hbm %s919_s17, 64  ;;  %p922_p11 = pneg %p1112_p10 }
  0x1a   : > { %p921_p2 = scmp.ne.s32.totalorder %s919_s17, %s920_s18  ;;  %s925_s23 = scalar_lea.hbm %s1909_s0, 128 }
  0x1b   : > { %p926_p0 = scmp.lt.s32.totalorder %s919_s17, %s1909_s0  ;;  %p927_p5 = scmp.lt.s32.totalorder %s925_s23, %s920_s18 }
  0x1c   : > { %p923_p12 = pnand %p922_p11, %p921_p2 }
  0x1d   : > { %p928_p7 = por %p927_p5, %p926_p0 }
  0x1e   : > { %p924_p13 = pneg %p923_p12 }
  0x20   : > { %p929_p9 = pnand %p928_p7, %p924_p13 }
  0x22   : > { %932 = shalt.err (!%p929_p9)
}
  0x23   : > { %861 = dma.hbm_to_vmem [thread:$0]  (!%p1112_p10), %s132_s5, 1024, %s134_s7, %s121_s14  }
  0x24   : > { %142 = sbr.rel (%p1079_p8) target bundleno = 181 (0xb5), region = 28  ;;  %s1129_s27 = sand.u32 (!%p1079_p8), 1, %s1010_s10  }
  0x25   : > { %s808_s29 = sshll.u32 (!%p1079_p8), %s1129_s27, 6  ;;  %s145_s30 = scalar_lea.sflag (!%p1079_p8), [#allocation3], %s1129_s27 }
  0x26   : > { %s1135_s3 = scalar_lea.vmem (!%p1079_p8), [#allocation2], %s808_s29 }
  0x29   : > { %993 = dma.done.wait (%p1066_p4), %s145_s30, 1024  }
  0x2a   : > { %995 = vsyncadd (%p1066_p4), %s145_s30, 4294966272 }
  0x2b   : > { %997 = dma.done.wait (%p40_p1), [#allocation5], 16  }
  0x2c   : > { %999 = vsyncadd (%p40_p1), [#allocation5], 4294967280 }
  0x2d   : > { %159 = sfence }
  0x2e   : > { %s811_s20 = sld [smem:[#allocation6 + $0x1]]  ;;  %v207_v0 = vld [vmem:[%s1135_s3] sm:$0xff]  ;;  %v208_v1 = vld [vmem:[%s1135_s3 + $0x8] sm:$0xff]  ;;  %v209_v2 = vld [vmem:[%s1135_s3 + $0x10] sm:$0xff] }
  0x2f   : > { %s812_s4 = sld [smem:[#allocation6 + $0x2]]  ;;  %v215_v3 = vmul.f32 13.5, %v207_v0  ;;  %v216_v5 = vmul.f32 13.5, %v208_v1  ;;  %v217_v6 = vmul.f32 13.5, %v209_v2 }
  0x30   : > { %s813_s5 = sld [smem:[#allocation6 + $0x3]] }
  0x31   : > { %s814_s6 = sld [smem:[#allocation6 + $0x4]]  ;;  %v1148_v4 = vadd.f32 14.5, %v215_v3  ;;  %v1159_v9 = vadd.f32 14.5, %v216_v5  ;;  %v1161_v10 = vadd.f32 14.5, %v217_v6 }
  0x32   : > { %s815_s15 = sld [smem:[#allocation6 + $0x5]] }
  0x33   : > { %s816_s7 = sld [smem:[#allocation6 + $0x6]]  ;;  %vm232_vm0 = vcmp.ge.f32.partialorder %v1148_v4, 2.0  ;;  %vm249_vm1 = vcmp.ge.f32.partialorder %v1148_v4, 3.0  ;;  %vm266_vm2 = vcmp.ge.f32.partialorder %v1148_v4, 4.0  ;;  %vm283_vm3 = vcmp.ge.f32.partialorder %v1148_v4, 5.0 }
  0x34   : > { %s817_s8 = sld [smem:[#allocation6 + $0x7]]  ;;  %v1151_v7 = vstv %s811_s20  ;;  %vm300_vm4 = vcmp.ge.f32.partialorder %v1148_v4, 6.0  ;;  %vm317_vm5 = vcmp.ge.f32.partialorder %v1148_v4, 7.0  ;;  %vm334_vm6 = vcmp.ge.f32.partialorder %v1148_v4, 8.0 }
  0x35   : > { %s1154_s14 = sld [smem:[#allocation6 + $0x8]]  ;;  %v1156_v8 = vstv %s812_s4  ;;  %vm351_vm7 = vcmp.ge.f32.partialorder %v1148_v4, 9.0  ;;  %vm368_vm8 = vcmp.ge.f32.partialorder %v1148_v4, 10.0  ;;  %vm385_vm9 = vcmp.ge.f32.partialorder %v1148_v4, 11.0 }
  0x36   : > { %s1163_s17 = sld [smem:[#allocation6 + $0x9]]  ;;  %v241_v11 = vsel %vm232_vm0, %v1156_v8, %v1151_v7  ;;  %v1167_v12 = vstv %s813_s5  ;;  %vm402_vm10 = vcmp.ge.f32.partialorder %v1148_v4, 12.0  ;;  %vm419_vm11 = vcmp.ge.f32.partialorder %v1148_v4, 13.0 }
  0x37   : > { %s1171_s18 = sld [smem:[#allocation6 + $0xa]]  ;;  %v258_v13 = vsel %vm249_vm1, %v1167_v12, %v241_v11  ;;  %v1174_v14 = vstv %s814_s6  ;;  %vm436_vm12 = vcmp.ge.f32.partialorder %v1148_v4, 14.0  ;;  %vm453_vm13 = vcmp.ge.f32.partialorder %v1148_v4, 15.0 }
  0x38   : > { %s1178_s19 = sld [smem:[#allocation6 + $0xb]]  ;;  %v275_v15 = vsel %vm266_vm2, %v1174_v14, %v258_v13  ;;  %v1181_v16 = vstv %s815_s15  ;;  %vm470_vm14 = vcmp.ge.f32.partialorder %v1148_v4, 16.0  ;;  %vm487_vm15 = vcmp.ge.f32.partialorder %v1148_v4, 17.0 }
  0x39   : > { %s1185_s22 = sld [smem:[#allocation6 + $0xc]]  ;;  %v292_v17 = vsel %vm283_vm3, %v1181_v16, %v275_v15  ;;  %v1188_v18 = vstv %s816_s7  ;;  %vm504_vm0 = vcmp.ge.f32.partialorder %v1148_v4, 18.0  ;;  %vm521_vm1 = vcmp.ge.f32.partialorder %v1148_v4, 19.0 }
  0x3a   : > { %s1192_s23 = sld [smem:[#allocation6 + $0xd]]  ;;  %v309_v19 = vsel %vm300_vm4, %v1188_v18, %v292_v17  ;;  %v1197_v20 = vstv %s817_s8  ;;  %vm538_vm2 = vcmp.ge.f32.partialorder %v1148_v4, 20.0  ;;  %vm555_vm3 = vcmp.ge.f32.partialorder %v1148_v4, 21.0 }
  0x3b   : > { %s1201_s24 = sld [smem:[#allocation6 + $0xe]]  ;;  %v326_v21 = vsel %vm317_vm5, %v1197_v20, %v309_v19  ;;  %v1207_v22 = vstv %s1154_s14  ;;  %vm233_vm4 = vcmp.ge.f32.partialorder %v1159_v9, 2.0  ;;  %vm572_vm5 = vcmp.ge.f32.partialorder %v1148_v4, 22.0 }
  0x3c   : > { %s1211_s28 = sld [smem:[#allocation6 + $0xf]]  ;;  %v343_v23 = vsel %vm334_vm6, %v1207_v22, %v326_v21  ;;  %v1217_v24 = vstv %s1163_s17  ;;  %v242_v31 = vsel %vm233_vm4, %v1156_v8, %v1151_v7  ;;  %vm250_vm6 = vcmp.ge.f32.partialorder %v1159_v9, 3.0 }
  0x3d   : > { %s1221_s30 = sld [smem:[#allocation6 + $0x10]]  ;;  %v360_v25 = vsel %vm351_vm7, %v1217_v24, %v343_v23  ;;  %v1227_v26 = vstv %s1171_s18  ;;  %vm589_vm7 = vcmp.ge.f32.partialorder %v1148_v4, 23.0  ;;  %v259_v34 = vsel %vm250_vm6, %v1167_v12, %v242_v31  ;;  %v210_v31 = vld [vmem:[%s1135_s3 + $0x18] sm:$0xff] }
  0x3e   : > { %s1231_s20 = sld [smem:[#allocation6 + $0x11]]  ;;  %v377_v27 = vsel %vm368_vm8, %v1227_v26, %v360_v25  ;;  %v1237_v28 = vstv %s1178_s19  ;;  %vm267_vm8 = vcmp.ge.f32.partialorder %v1159_v9, 4.0  ;;  %vm623_vm4 = vcmp.ge.f32.partialorder %v1148_v4, 25.0 }
  0x3f   : > { %s1241_s4 = sld [smem:[#allocation6 + $0x12]]  ;;  %v394_v29 = vsel %vm385_vm9, %v1237_v28, %v377_v27  ;;  %v1247_v30 = vstv %s1185_s22  ;;  %vm606_vm9 = vcmp.ge.f32.partialorder %v1148_v4, 24.0  ;;  %v276_v37 = vsel %vm267_vm8, %v1174_v14, %v259_v34 }
  0x40   : > { %s1253_s5 = sld [smem:[#allocation6 + $0x13]]  ;;  %v411_v32 = vsel %vm402_vm10, %v1247_v30, %v394_v29  ;;  %v1259_v33 = vstv %s1192_s23  ;;  %vm284_vm10 = vcmp.ge.f32.partialorder %v1159_v9, 5.0  ;;  %vm640_vm6 = vcmp.ge.f32.partialorder %v1148_v4, 26.0  ;;  %s1404_s23 = scalar_lea.vmem [#allocation7], %s808_s29 }
  0x41   : > { %s1264_s6 = sld [smem:[#allocation6 + $0x14]]  ;;  %v428_v35 = vsel %vm419_vm11, %v1259_v33, %v411_v32  ;;  %v1270_v36 = vstv %s1201_s24  ;;  %v293_v40 = vsel %vm284_vm10, %v1181_v16, %v276_v37  ;;  %vm301_vm11 = vcmp.ge.f32.partialorder %v1159_v9, 6.0  ;;  %s845_s29 = sshll.u32 %s1057_s13, 6 }
  0x42   : > { %s1275_s15 = sld [smem:[#allocation6 + $0x15]]  ;;  %v445_v38 = vsel %vm436_vm12, %v1270_v36, %v428_v35  ;;  %v1281_v39 = vstv %s1211_s28  ;;  %v310_v43 = vsel %vm301_vm11, %v1188_v18, %v293_v40  ;;  %vm318_vm12 = vcmp.ge.f32.partialorder %v1159_v9, 7.0  ;;  %s713_s28 = scalar_lea.hbm %s1911_s2, %s845_s29 }
  0x43   : > { %s1286_s7 = sld [smem:[#allocation6 + $0x16]]  ;;  %v462_v41 = vsel %vm453_vm13, %v1281_v39, %v445_v38  ;;  %v1292_v42 = vstv %s1221_s30  ;;  %vm657_vm8 = vcmp.ge.f32.partialorder %v1148_v4, 27.0  ;;  %v327_v46 = vsel %vm318_vm12, %v1197_v20, %v310_v43  ;;  %s715_s13 = sshll.u32 %s1404_s23, 4  ;;  %s716_s13 = int_to_ptr.vmem [resolvable:$true] %s715_s13 }
  0x44   : > { %s1297_s8 = sld [smem:[#allocation6 + $0x17]]  ;;  %v479_v44 = vsel %vm470_vm14, %v1292_v42, %v462_v41  ;;  %v1303_v45 = vstv %s1231_s20  ;;  %vm335_vm13 = vcmp.ge.f32.partialorder %v1159_v9, 8.0  ;;  %vm674_vm14 = vcmp.ge.f32.partialorder %v1148_v4, 28.0  ;;  %s717_s30 = sshll.u32 %s713_s28, 4  ;;  %s718_s30 = int_to_ptr.hbm [resolvable:$true] %s717_s30 }
  0x45   : > { %s1308_s14 = sld [smem:[#allocation6 + $0x18]]  ;;  %v496_v47 = vsel %vm487_vm15, %v1303_v45, %v479_v44  ;;  %v1314_v48 = vstv %s1241_s4  ;;  %v344_v49 = vsel %vm335_vm13, %v1207_v22, %v327_v46  ;;  %vm352_vm10 = vcmp.ge.f32.partialorder %v1159_v9, 9.0  ;;  %s702_s20 = scalar_lea.sflag [#allocation4], %s1129_s27 }
  0x46   : > { %s835_s17 = sld [smem:[#allocation6 + $0x19]]  ;;  %v513_v50 = vsel %vm504_vm0, %v1314_v48, %v496_v47  ;;  %v1323_v51 = vstv %s1253_s5  ;;  %v361_v52 = vsel %vm352_vm10, %v1217_v24, %v344_v49  ;;  %vm369_vm15 = vcmp.ge.f32.partialorder %v1159_v9, 10.0  ;;  %s962_s4 = sshra.s32 %s718_s30, 4  ;;  %s963_s4 = int_to_ptr.hbm [resolvable:$true] %s962_s4 }
  0x47   : > { %s836_s18 = sld [smem:[#allocation6 + $0x1a]]  ;;  %v530_v53 = vsel %vm521_vm1, %v1323_v51, %v513_v50  ;;  %v1331_v54 = vstv %s1264_s6  ;;  %v378_v55 = vsel %vm369_vm15, %v1227_v26, %v361_v52  ;;  %vm386_vm11 = vcmp.ge.f32.partialorder %v1159_v9, 11.0  ;;  %s964_s5 = scalar_lea.hbm %s963_s4, 64 }
  0x48   : > { %s837_s19 = sld [smem:[#allocation6 + $0x1b]]  ;;  %v547_v56 = vsel %vm538_vm2, %v1331_v54, %v530_v53  ;;  %v1339_v57 = vstv %s1275_s15  ;;  %v395_v58 = vsel %vm386_vm11, %v1237_v28, %v378_v55  ;;  %vm403_vm0 = vcmp.ge.f32.partialorder %v1159_v9, 12.0  ;;  %p965_p1 = scmp.ne.s32.totalorder %s963_s4, %s964_s5 }
  0x49   : > { %s838_s22 = sld [smem:[#allocation6 + $0x1c]]  ;;  %v564_v59 = vsel %vm555_vm3, %v1339_v57, %v547_v56  ;;  %v1347_v60 = vstv %s1286_s7  ;;  %v412_v61 = vsel %vm403_vm0, %v1247_v30, %v395_v58  ;;  %vm420_vm1 = vcmp.ge.f32.partialorder %v1159_v9, 13.0  ;;  %s968_s7 = scalar_lea.hbm %s1911_s2, 128 }
  0x4a   : > { %v581_v62 = vsel %vm572_vm5, %v1347_v60, %v564_v59  ;;  %v1355_v63 = vstv %s1297_s8  ;;  %v429_v0 = vsel %vm420_vm1, %v1259_v33, %v412_v61  ;;  %vm437_vm2 = vcmp.ge.f32.partialorder %v1159_v9, 14.0  ;;  %p966_p4 = pnand %p965_p1, %p1102_p3  ;;  %p969_p9 = scmp.lt.s32.totalorder %s963_s4, %s1911_s2 }
  0x4b   : > { %v598_v1 = vsel %vm589_vm7, %v1355_v63, %v581_v62  ;;  %v1363_v2 = vstv %s1308_s14  ;;  %v446_v3 = vsel %vm437_vm2, %v1270_v36, %v429_v0  ;;  %vm454_vm3 = vcmp.ge.f32.partialorder %v1159_v9, 15.0  ;;  %p970_p10 = scmp.lt.s32.totalorder %s968_s7, %s964_s5 }
  0x4c   : > { %v615_v5 = vsel %vm606_vm9, %v1363_v2, %v598_v1  ;;  %v1370_v6 = vstv %s835_s17  ;;  %v463_v11 = vsel %vm454_vm3, %v1281_v39, %v446_v3  ;;  %vm471_vm5 = vcmp.ge.f32.partialorder %v1159_v9, 16.0  ;;  %p967_p8 = pneg %p966_p4 }
  0x4d   : > { %v632_v13 = vsel %vm623_vm4, %v1370_v6, %v615_v5  ;;  %v1377_v15 = vstv %s836_s18  ;;  %v480_v17 = vsel %vm471_vm5, %v1292_v42, %v463_v11  ;;  %vm488_vm7 = vcmp.ge.f32.partialorder %v1159_v9, 17.0  ;;  %p971_p2 = por %p970_p10, %p969_p9 }
  0x4e   : > { %v649_v19 = vsel %vm640_vm6, %v1377_v15, %v632_v13  ;;  %v1384_v21 = vstv %s837_s19  ;;  %v497_v23 = vsel %vm488_vm7, %v1303_v45, %v480_v17  ;;  %vm505_vm9 = vcmp.ge.f32.partialorder %v1159_v9, 18.0 }
  0x4f   : > { %v666_v25 = vsel %vm657_vm8, %v1384_v21, %v649_v19  ;;  %v1391_v27 = vstv %s838_s22  ;;  %v514_v29 = vsel %vm505_vm9, %v1314_v48, %v497_v23  ;;  %vm522_vm4 = vcmp.ge.f32.partialorder %v1159_v9, 19.0  ;;  %p972_p11 = pnand %p971_p2, %p967_p8 }
  0x50   : > { %v683_v32 = vsel %vm674_vm14, %v1391_v27, %v666_v25  ;;  %v531_v34 = vsel %vm522_vm4, %v1323_v51, %v514_v29  ;;  %vm539_vm6 = vcmp.ge.f32.partialorder %v1159_v9, 20.0  ;;  %vm556_vm12 = vcmp.ge.f32.partialorder %v1159_v9, 21.0 }
  0x51   : > { %693 = vst [vmem:[%s1404_s23] sm:$0xff] %v683_v32  ;;  %v548_v35 = vsel %vm539_vm6, %v1331_v54, %v531_v34  ;;  %vm573_vm8 = vcmp.ge.f32.partialorder %v1159_v9, 22.0  ;;  %vm590_vm13 = vcmp.ge.f32.partialorder %v1159_v9, 23.0  ;;  %vm607_vm14 = vcmp.ge.f32.partialorder %v1159_v9, 24.0 }
  0x52   : > { %v565_v4 = vsel %vm556_vm12, %v1339_v57, %v548_v35  ;;  %vm624_vm10 = vcmp.ge.f32.partialorder %v1159_v9, 25.0  ;;  %v218_v37 = vmul.f32 13.5, %v210_v31  ;;  %vm641_vm15 = vcmp.ge.f32.partialorder %v1159_v9, 26.0 }
  0x53   : > { %v582_v38 = vsel %vm573_vm8, %v1347_v60, %v565_v4  ;;  %vm234_vm11 = vcmp.ge.f32.partialorder %v1161_v10, 2.0  ;;  %vm251_vm0 = vcmp.ge.f32.partialorder %v1161_v10, 3.0  ;;  %vm268_vm1 = vcmp.ge.f32.partialorder %v1161_v10, 4.0 }
  0x54   : > { %v599_v40 = vsel %vm590_vm13, %v1355_v63, %v582_v38  ;;  %v243_v41 = vsel %vm234_vm11, %v1156_v8, %v1151_v7  ;;  %vm285_vm2 = vcmp.ge.f32.partialorder %v1161_v10, 5.0  ;;  %vm658_vm3 = vcmp.ge.f32.partialorder %v1159_v9, 27.0 }
  0x55   : > { %v616_v43 = vsel %vm607_vm14, %v1363_v2, %v599_v40  ;;  %v260_v44 = vsel %vm251_vm0, %v1167_v12, %v243_v41  ;;  %vm302_vm5 = vcmp.ge.f32.partialorder %v1161_v10, 6.0  ;;  %vm675_vm7 = vcmp.ge.f32.partialorder %v1159_v9, 28.0 }
  0x56   : > { %v633_v46 = vsel %vm624_vm10, %v1370_v6, %v616_v43  ;;  %v277_v47 = vsel %vm268_vm1, %v1174_v14, %v260_v44  ;;  %vm319_vm9 = vcmp.ge.f32.partialorder %v1161_v10, 7.0  ;;  %vm336_vm4 = vcmp.ge.f32.partialorder %v1161_v10, 8.0  ;;  %v211_v44 = vld [vmem:[%s1135_s3 + $0x20] sm:$0xff] }
  0x57   : > { %v650_v49 = vsel %vm641_vm15, %v1377_v15, %v633_v46  ;;  %v294_v50 = vsel %vm285_vm2, %v1181_v16, %v277_v47  ;;  %vm353_vm6 = vcmp.ge.f32.partialorder %v1161_v10, 9.0  ;;  %vm370_vm12 = vcmp.ge.f32.partialorder %v1161_v10, 10.0 }
  0x58   : > { %v667_v52 = vsel %vm658_vm3, %v1384_v21, %v650_v49  ;;  %v311_v53 = vsel %vm302_vm5, %v1188_v18, %v294_v50  ;;  %vm387_vm8 = vcmp.ge.f32.partialorder %v1161_v10, 11.0  ;;  %v1442_v58 = vadd.f32 14.5, %v218_v37 }
  0x59   : > { %v684_v55 = vsel %vm675_vm7, %v1391_v27, %v667_v52  ;;  %v328_v9 = vsel %vm319_vm9, %v1197_v20, %v311_v53  ;;  %vm404_vm13 = vcmp.ge.f32.partialorder %v1161_v10, 12.0  ;;  %vm421_vm14 = vcmp.ge.f32.partialorder %v1161_v10, 13.0 }
  0x5a   : > { %694 = vst [vmem:[%s1404_s23 + $0x8] sm:$0xff] %v684_v55  ;;  %v345_v56 = vsel %vm336_vm4, %v1207_v22, %v328_v9  ;;  %vm438_vm10 = vcmp.ge.f32.partialorder %v1161_v10, 14.0  ;;  %vm455_vm15 = vcmp.ge.f32.partialorder %v1161_v10, 15.0  ;;  %vm472_vm11 = vcmp.ge.f32.partialorder %v1161_v10, 16.0 }
  0x5b   : > { %v362_v59 = vsel %vm353_vm6, %v1217_v24, %v345_v56  ;;  %vm489_vm0 = vcmp.ge.f32.partialorder %v1161_v10, 17.0  ;;  %vm506_vm1 = vcmp.ge.f32.partialorder %v1161_v10, 18.0  ;;  %vm523_vm2 = vcmp.ge.f32.partialorder %v1161_v10, 19.0 }
  0x5c   : > { %v379_v61 = vsel %vm370_vm12, %v1227_v26, %v362_v59  ;;  %vm540_vm3 = vcmp.ge.f32.partialorder %v1161_v10, 20.0  ;;  %vm557_vm5 = vcmp.ge.f32.partialorder %v1161_v10, 21.0  ;;  %vm235_vm7 = vcmp.ge.f32.partialorder %v1442_v58, 2.0 }
  0x5d   : > { %v396_v62 = vsel %vm387_vm8, %v1237_v28, %v379_v61  ;;  %vm252_vm9 = vcmp.ge.f32.partialorder %v1442_v58, 3.0  ;;  %v244_v3 = vsel %vm235_vm7, %v1156_v8, %v1151_v7  ;;  %vm269_vm4 = vcmp.ge.f32.partialorder %v1442_v58, 4.0 }
  0x5e   : > { %v413_v0 = vsel %vm404_vm13, %v1247_v30, %v396_v62  ;;  %vm286_vm6 = vcmp.ge.f32.partialorder %v1442_v58, 5.0  ;;  %vm574_vm12 = vcmp.ge.f32.partialorder %v1161_v10, 22.0  ;;  %v261_v11 = vsel %vm252_vm9, %v1167_v12, %v244_v3  ;;  %v212_v3 = vld [vmem:[%s1135_s3 + $0x28] sm:$0xff] }
  0x5f   : > { %v430_v1 = vsel %vm421_vm14, %v1259_v33, %v413_v0  ;;  %vm303_vm8 = vcmp.ge.f32.partialorder %v1442_v58, 6.0  ;;  %vm591_vm13 = vcmp.ge.f32.partialorder %v1161_v10, 23.0  ;;  %v278_v17 = vsel %vm269_vm4, %v1174_v14, %v261_v11 }
  0x60   : > { %v447_v5 = vsel %vm438_vm10, %v1270_v36, %v430_v1  ;;  %vm320_vm14 = vcmp.ge.f32.partialorder %v1442_v58, 7.0  ;;  %vm608_vm10 = vcmp.ge.f32.partialorder %v1161_v10, 24.0  ;;  %v295_v23 = vsel %vm286_vm6, %v1181_v16, %v278_v17 }
  0x61   : > { %v464_v13 = vsel %vm455_vm15, %v1281_v39, %v447_v5  ;;  %vm337_vm7 = vcmp.ge.f32.partialorder %v1442_v58, 8.0  ;;  %vm625_vm15 = vcmp.ge.f32.partialorder %v1161_v10, 25.0  ;;  %v312_v29 = vsel %vm303_vm8, %v1188_v18, %v295_v23 }
  0x62   : > { %v481_v19 = vsel %vm472_vm11, %v1292_v42, %v464_v13  ;;  %vm354_vm9 = vcmp.ge.f32.partialorder %v1442_v58, 9.0  ;;  %vm642_vm11 = vcmp.ge.f32.partialorder %v1161_v10, 26.0  ;;  %v329_v32 = vsel %vm320_vm14, %v1197_v20, %v312_v29 }
  0x63   : > { %v498_v25 = vsel %vm489_vm0, %v1303_v45, %v481_v19  ;;  %vm371_vm4 = vcmp.ge.f32.partialorder %v1442_v58, 10.0  ;;  %vm659_vm0 = vcmp.ge.f32.partialorder %v1161_v10, 27.0  ;;  %v346_v35 = vsel %vm337_vm7, %v1207_v22, %v329_v32 }
  0x64   : > { %v515_v31 = vsel %vm506_vm1, %v1314_v48, %v498_v25  ;;  %vm388_vm6 = vcmp.ge.f32.partialorder %v1442_v58, 11.0  ;;  %vm676_vm1 = vcmp.ge.f32.partialorder %v1161_v10, 28.0  ;;  %v363_v37 = vsel %vm354_vm9, %v1217_v24, %v346_v35  ;;  %v213_v10 = vld [vmem:[%s1135_s3 + $0x30] sm:$0xff]  ;;  %v214_v25 = vld [vmem:[%s1135_s3 + $0x38] sm:$0xff] }
  0x65   : > { %v532_v34 = vsel %vm523_vm2, %v1323_v51, %v515_v31  ;;  %vm405_vm8 = vcmp.ge.f32.partialorder %v1442_v58, 12.0  ;;  %v380_v40 = vsel %vm371_vm4, %v1227_v26, %v363_v37  ;;  %vm422_vm2 = vcmp.ge.f32.partialorder %v1442_v58, 13.0 }
  0x66   : > { %v549_v4 = vsel %vm540_vm3, %v1331_v54, %v532_v34  ;;  %vm439_vm14 = vcmp.ge.f32.partialorder %v1442_v58, 14.0  ;;  %v397_v43 = vsel %vm388_vm6, %v1237_v28, %v380_v40  ;;  %vm456_vm3 = vcmp.ge.f32.partialorder %v1442_v58, 15.0 }
  0x67   : > { %v566_v38 = vsel %vm557_vm5, %v1339_v57, %v549_v4  ;;  %vm473_vm7 = vcmp.ge.f32.partialorder %v1442_v58, 16.0  ;;  %v414_v47 = vsel %vm405_vm8, %v1247_v30, %v397_v43  ;;  %vm490_vm5 = vcmp.ge.f32.partialorder %v1442_v58, 17.0 }
  0x68   : > { %v583_v41 = vsel %vm574_vm12, %v1347_v60, %v566_v38  ;;  %vm507_vm9 = vcmp.ge.f32.partialorder %v1442_v58, 18.0  ;;  %v431_v50 = vsel %vm422_vm2, %v1259_v33, %v414_v47  ;;  %vm524_vm12 = vcmp.ge.f32.partialorder %v1442_v58, 19.0 }
  0x69   : > { %v600_v46 = vsel %vm591_vm13, %v1355_v63, %v583_v41  ;;  %vm541_vm4 = vcmp.ge.f32.partialorder %v1442_v58, 20.0  ;;  %v448_v53 = vsel %vm439_vm14, %v1270_v36, %v431_v50  ;;  %vm558_vm13 = vcmp.ge.f32.partialorder %v1442_v58, 21.0 }
  0x6a   : > { %v617_v49 = vsel %vm608_vm10, %v1363_v2, %v600_v46  ;;  %v219_v55 = vmul.f32 13.5, %v211_v44  ;;  %v465_v56 = vsel %vm456_vm3, %v1281_v39, %v448_v53  ;;  %vm575_vm10 = vcmp.ge.f32.partialorder %v1442_v58, 22.0 }
  0x6b   : > { %v634_v52 = vsel %vm625_vm15, %v1370_v6, %v617_v49  ;;  %vm592_vm15 = vcmp.ge.f32.partialorder %v1442_v58, 23.0  ;;  %v482_v61 = vsel %vm473_vm7, %v1292_v42, %v465_v56  ;;  %vm609_vm6 = vcmp.ge.f32.partialorder %v1442_v58, 24.0 }
  0x6c   : > { %v651_v9 = vsel %vm642_vm11, %v1377_v15, %v634_v52  ;;  %v1552_v62 = vadd.f32 14.5, %v219_v55  ;;  %v499_v1 = vsel %vm490_vm5, %v1303_v45, %v482_v61  ;;  %vm626_vm11 = vcmp.ge.f32.partialorder %v1442_v58, 25.0 }
  0x6d   : > { %v668_v59 = vsel %vm659_vm0, %v1384_v21, %v651_v9  ;;  %vm643_vm0 = vcmp.ge.f32.partialorder %v1442_v58, 26.0  ;;  %v516_v5 = vsel %vm507_vm9, %v1314_v48, %v499_v1  ;;  %vm660_vm14 = vcmp.ge.f32.partialorder %v1442_v58, 27.0 }
  0x6e   : > { %v685_v0 = vsel %vm676_vm1, %v1391_v27, %v668_v59  ;;  %vm236_vm8 = vcmp.ge.f32.partialorder %v1552_v62, 2.0  ;;  %vm253_vm2 = vcmp.ge.f32.partialorder %v1552_v62, 3.0  ;;  %vm270_vm1 = vcmp.ge.f32.partialorder %v1552_v62, 4.0 }
  0x6f   : > { %695 = vst [vmem:[%s1404_s23 + $0x10] sm:$0xff] %v685_v0  ;;  %v533_v11 = vsel %vm524_vm12, %v1323_v51, %v516_v5  ;;  %v245_v13 = vsel %vm236_vm8, %v1156_v8, %v1151_v7  ;;  %vm287_vm3 = vcmp.ge.f32.partialorder %v1552_v62, 5.0  ;;  %vm304_vm7 = vcmp.ge.f32.partialorder %v1552_v62, 6.0 }
  0x70   : > { %v550_v17 = vsel %vm541_vm4, %v1331_v54, %v533_v11  ;;  %v262_v19 = vsel %vm253_vm2, %v1167_v12, %v245_v13  ;;  %v220_v23 = vmul.f32 13.5, %v212_v3  ;;  %vm321_vm5 = vcmp.ge.f32.partialorder %v1552_v62, 7.0 }
  0x71   : > { %v567_v29 = vsel %vm558_vm13, %v1339_v57, %v550_v17  ;;  %v279_v31 = vsel %vm270_vm1, %v1174_v14, %v262_v19  ;;  %v221_v32 = vmul.f32 13.5, %v213_v10  ;;  %vm677_vm9 = vcmp.ge.f32.partialorder %v1442_v58, 28.0 }
  0x72   : > { %v584_v34 = vsel %vm575_vm10, %v1347_v60, %v567_v29  ;;  %v296_v35 = vsel %vm287_vm3, %v1181_v16, %v279_v31  ;;  %vm338_vm12 = vcmp.ge.f32.partialorder %v1552_v62, 8.0  ;;  %vm355_vm4 = vcmp.ge.f32.partialorder %v1552_v62, 9.0 }
  0x73   : > { %v601_v4 = vsel %vm592_vm15, %v1355_v63, %v584_v34  ;;  %v313_v37 = vsel %vm304_vm7, %v1188_v18, %v296_v35  ;;  %v1600_v38 = vmul.f32 13.5, %v214_v25  ;;  %vm372_vm13 = vcmp.ge.f32.partialorder %v1552_v62, 10.0 }
  0x74   : > { %v618_v40 = vsel %vm609_vm6, %v1363_v2, %v601_v4  ;;  %v330_v41 = vsel %vm321_vm5, %v1197_v20, %v313_v37  ;;  %v1607_v43 = vadd.f32 14.5, %v220_v23  ;;  %vm389_vm10 = vcmp.ge.f32.partialorder %v1552_v62, 11.0 }
  0x75   : > { %v635_v44 = vsel %vm626_vm11, %v1370_v6, %v618_v40  ;;  %v347_v46 = vsel %vm338_vm12, %v1207_v22, %v330_v41  ;;  %v1614_v47 = vadd.f32 14.5, %v221_v32  ;;  %vm406_vm15 = vcmp.ge.f32.partialorder %v1552_v62, 12.0 }
  0x76   : > { %v652_v49 = vsel %vm643_vm0, %v1377_v15, %v635_v44  ;;  %v364_v50 = vsel %vm355_vm4, %v1217_v24, %v347_v46  ;;  %vm423_vm6 = vcmp.ge.f32.partialorder %v1552_v62, 13.0  ;;  %vm440_vm11 = vcmp.ge.f32.partialorder %v1552_v62, 14.0 }
  0x77   : > { %v669_v52 = vsel %vm660_vm14, %v1384_v21, %v652_v49  ;;  %v381_v53 = vsel %vm372_vm13, %v1227_v26, %v364_v50  ;;  %vm457_vm8 = vcmp.ge.f32.partialorder %v1552_v62, 15.0  ;;  %vm474_vm0 = vcmp.ge.f32.partialorder %v1552_v62, 16.0 }
  0x78   : > { %v686_v55 = vsel %vm677_vm9, %v1391_v27, %v669_v52  ;;  %v398_v9 = vsel %vm389_vm10, %v1237_v28, %v381_v53  ;;  %vm491_vm2 = vcmp.ge.f32.partialorder %v1552_v62, 17.0  ;;  %vm508_vm1 = vcmp.ge.f32.partialorder %v1552_v62, 18.0 }
  0x79   : > { %696 = vst [vmem:[%s1404_s23 + $0x18] sm:$0xff] %v686_v55  ;;  %v415_v56 = vsel %vm406_vm15, %v1247_v30, %v398_v9  ;;  %vm525_vm14 = vcmp.ge.f32.partialorder %v1552_v62, 19.0  ;;  %vm542_vm3 = vcmp.ge.f32.partialorder %v1552_v62, 20.0  ;;  %vm559_vm7 = vcmp.ge.f32.partialorder %v1552_v62, 21.0 }
  0x7a   : > { %v432_v59 = vsel %vm423_vm6, %v1259_v33, %v415_v56  ;;  %vm237_vm5 = vcmp.ge.f32.partialorder %v1607_v43, 2.0  ;;  %vm254_vm9 = vcmp.ge.f32.partialorder %v1607_v43, 3.0  ;;  %vm271_vm12 = vcmp.ge.f32.partialorder %v1607_v43, 4.0 }
  0x7b   : > { %v449_v58 = vsel %vm440_vm11, %v1270_v36, %v432_v59  ;;  %v246_v61 = vsel %vm237_vm5, %v1156_v8, %v1151_v7  ;;  %vm288_vm4 = vcmp.ge.f32.partialorder %v1607_v43, 5.0  ;;  %vm576_vm13 = vcmp.ge.f32.partialorder %v1552_v62, 22.0 }
  0x7c   : > { %v466_v0 = vsel %vm457_vm8, %v1281_v39, %v449_v58  ;;  %v263_v1 = vsel %vm254_vm9, %v1167_v12, %v246_v61  ;;  %vm305_vm10 = vcmp.ge.f32.partialorder %v1607_v43, 6.0  ;;  %vm593_vm15 = vcmp.ge.f32.partialorder %v1552_v62, 23.0 }
  0x7d   : > { %v483_v3 = vsel %vm474_vm0, %v1292_v42, %v466_v0  ;;  %v280_v5 = vsel %vm271_vm12, %v1174_v14, %v263_v1  ;;  %vm322_vm6 = vcmp.ge.f32.partialorder %v1607_v43, 7.0  ;;  %vm610_vm11 = vcmp.ge.f32.partialorder %v1552_v62, 24.0 }
  0x7e   : > { %v500_v10 = vsel %vm491_vm2, %v1303_v45, %v483_v3  ;;  %v297_v11 = vsel %vm288_vm4, %v1181_v16, %v280_v5  ;;  %vm339_vm8 = vcmp.ge.f32.partialorder %v1607_v43, 8.0  ;;  %vm627_vm0 = vcmp.ge.f32.partialorder %v1552_v62, 25.0 }
  0x7f   : > { %v517_v13 = vsel %vm508_vm1, %v1314_v48, %v500_v10  ;;  %v314_v17 = vsel %vm305_vm10, %v1188_v18, %v297_v11  ;;  %vm356_vm5 = vcmp.ge.f32.partialorder %v1607_v43, 9.0  ;;  %vm644_vm2 = vcmp.ge.f32.partialorder %v1552_v62, 26.0 }
  0x80   : > { %v534_v19 = vsel %vm525_vm14, %v1323_v51, %v517_v13  ;;  %v331_v23 = vsel %vm322_vm6, %v1197_v20, %v314_v17  ;;  %vm373_vm9 = vcmp.ge.f32.partialorder %v1607_v43, 10.0  ;;  %vm661_vm1 = vcmp.ge.f32.partialorder %v1552_v62, 27.0 }
  0x81   : > { %v551_v25 = vsel %vm542_vm3, %v1331_v54, %v534_v19  ;;  %v348_v29 = vsel %vm339_vm8, %v1207_v22, %v331_v23  ;;  %vm390_vm12 = vcmp.ge.f32.partialorder %v1607_v43, 11.0  ;;  %vm678_vm14 = vcmp.ge.f32.partialorder %v1552_v62, 28.0 }
  0x82   : > { %v568_v31 = vsel %vm559_vm7, %v1339_v57, %v551_v25  ;;  %v365_v32 = vsel %vm356_vm5, %v1217_v24, %v348_v29  ;;  %vm407_vm4 = vcmp.ge.f32.partialorder %v1607_v43, 12.0  ;;  %vm424_vm3 = vcmp.ge.f32.partialorder %v1607_v43, 13.0 }
  0x83   : > { %v585_v34 = vsel %vm576_vm13, %v1347_v60, %v568_v31  ;;  %v382_v35 = vsel %vm373_vm9, %v1227_v26, %v365_v32  ;;  %vm441_vm10 = vcmp.ge.f32.partialorder %v1607_v43, 14.0  ;;  %vm458_vm7 = vcmp.ge.f32.partialorder %v1607_v43, 15.0 }
  0x84   : > { %v602_v4 = vsel %vm593_vm15, %v1355_v63, %v585_v34  ;;  %v399_v37 = vsel %vm390_vm12, %v1237_v28, %v382_v35  ;;  %vm475_vm6 = vcmp.ge.f32.partialorder %v1607_v43, 16.0  ;;  %vm492_vm13 = vcmp.ge.f32.partialorder %v1607_v43, 17.0 }
  0x85   : > { %v619_v40 = vsel %vm610_vm11, %v1363_v2, %v602_v4  ;;  %v416_v41 = vsel %vm407_vm4, %v1247_v30, %v399_v37  ;;  %vm509_vm8 = vcmp.ge.f32.partialorder %v1607_v43, 18.0  ;;  %vm526_vm15 = vcmp.ge.f32.partialorder %v1607_v43, 19.0 }
  0x86   : > { %v636_v44 = vsel %vm627_vm0, %v1370_v6, %v619_v40  ;;  %v433_v46 = vsel %vm424_vm3, %v1259_v33, %v416_v41  ;;  %vm543_vm5 = vcmp.ge.f32.partialorder %v1607_v43, 20.0  ;;  %vm560_vm11 = vcmp.ge.f32.partialorder %v1607_v43, 21.0 }
  0x87   : > { %v653_v49 = vsel %vm644_vm2, %v1377_v15, %v636_v44  ;;  %v450_v50 = vsel %vm441_vm10, %v1270_v36, %v433_v46  ;;  %vm238_vm9 = vcmp.ge.f32.partialorder %v1614_v47, 2.0  ;;  %vm255_vm0 = vcmp.ge.f32.partialorder %v1614_v47, 3.0 }
  0x88   : > { %v670_v52 = vsel %vm661_vm1, %v1384_v21, %v653_v49  ;;  %v467_v53 = vsel %vm458_vm7, %v1281_v39, %v450_v50  ;;  %v247_v55 = vsel %vm238_vm9, %v1156_v8, %v1151_v7  ;;  %vm272_vm2 = vcmp.ge.f32.partialorder %v1614_v47, 4.0 }
  0x89   : > { %v687_v9 = vsel %vm678_vm14, %v1391_v27, %v670_v52  ;;  %v484_v56 = vsel %vm475_vm6, %v1292_v42, %v467_v53  ;;  %v264_v59 = vsel %vm255_vm0, %v1167_v12, %v247_v55  ;;  %vm289_vm1 = vcmp.ge.f32.partialorder %v1614_v47, 5.0 }
  0x8a   : > { %697 = vst [vmem:[%s1404_s23 + $0x20] sm:$0xff] %v687_v9  ;;  %v501_v58 = vsel %vm492_vm13, %v1303_v45, %v484_v56  ;;  %v281_v61 = vsel %vm272_vm2, %v1174_v14, %v264_v59  ;;  %vm306_vm12 = vcmp.ge.f32.partialorder %v1614_v47, 6.0  ;;  %vm323_vm14 = vcmp.ge.f32.partialorder %v1614_v47, 7.0 }
  0x8b   : > { %v518_v62 = vsel %vm509_vm8, %v1314_v48, %v501_v58  ;;  %v298_v0 = vsel %vm289_vm1, %v1181_v16, %v281_v61  ;;  %vm340_vm4 = vcmp.ge.f32.partialorder %v1614_v47, 8.0  ;;  %vm577_vm3 = vcmp.ge.f32.partialorder %v1607_v43, 22.0 }
  0x8c   : > { %v535_v1 = vsel %vm526_vm15, %v1323_v51, %v518_v62  ;;  %v315_v3 = vsel %vm306_vm12, %v1188_v18, %v298_v0  ;;  %vm357_vm10 = vcmp.ge.f32.partialorder %v1614_v47, 9.0  ;;  %vm594_vm7 = vcmp.ge.f32.partialorder %v1607_v43, 23.0 }
  0x8d   : > { %v552_v5 = vsel %vm543_vm5, %v1331_v54, %v535_v1  ;;  %v332_v10 = vsel %vm323_vm14, %v1197_v20, %v315_v3  ;;  %vm374_vm6 = vcmp.ge.f32.partialorder %v1614_v47, 10.0  ;;  %vm611_vm13 = vcmp.ge.f32.partialorder %v1607_v43, 24.0 }
  0x8e   : > { %v569_v11 = vsel %vm560_vm11, %v1339_v57, %v552_v5  ;;  %v349_v13 = vsel %vm340_vm4, %v1207_v22, %v332_v10  ;;  %vm391_vm8 = vcmp.ge.f32.partialorder %v1614_v47, 11.0  ;;  %vm628_vm15 = vcmp.ge.f32.partialorder %v1607_v43, 25.0 }
  0x8f   : > { %v586_v17 = vsel %vm577_vm3, %v1347_v60, %v569_v11  ;;  %v366_v19 = vsel %vm357_vm10, %v1217_v24, %v349_v13  ;;  %vm408_vm5 = vcmp.ge.f32.partialorder %v1614_v47, 12.0  ;;  %vm645_vm9 = vcmp.ge.f32.partialorder %v1607_v43, 26.0 }
  0x90   : > { %v603_v23 = vsel %vm594_vm7, %v1355_v63, %v586_v17  ;;  %v383_v25 = vsel %vm374_vm6, %v1227_v26, %v366_v19  ;;  %vm425_vm11 = vcmp.ge.f32.partialorder %v1614_v47, 13.0  ;;  %vm662_vm0 = vcmp.ge.f32.partialorder %v1607_v43, 27.0 }
  0x91   : > { %v620_v29 = vsel %vm611_vm13, %v1363_v2, %v603_v23  ;;  %v400_v31 = vsel %vm391_vm8, %v1237_v28, %v383_v25  ;;  %vm442_vm2 = vcmp.ge.f32.partialorder %v1614_v47, 14.0  ;;  %vm679_vm1 = vcmp.ge.f32.partialorder %v1607_v43, 28.0 }
  0x92   : > { %v637_v32 = vsel %vm628_vm15, %v1370_v6, %v620_v29  ;;  %v417_v34 = vsel %vm408_vm5, %v1247_v30, %v400_v31  ;;  %vm459_vm12 = vcmp.ge.f32.partialorder %v1614_v47, 15.0  ;;  %vm476_vm14 = vcmp.ge.f32.partialorder %v1614_v47, 16.0 }
  0x93   : > { %v654_v35 = vsel %vm645_vm9, %v1377_v15, %v637_v32  ;;  %v434_v4 = vsel %vm425_vm11, %v1259_v33, %v417_v34  ;;  %vm493_vm4 = vcmp.ge.f32.partialorder %v1614_v47, 17.0  ;;  %vm510_vm3 = vcmp.ge.f32.partialorder %v1614_v47, 18.0 }
  0x94   : > { %v671_v37 = vsel %vm662_vm0, %v1384_v21, %v654_v35  ;;  %v451_v40 = vsel %vm442_vm2, %v1270_v36, %v434_v4  ;;  %vm527_vm10 = vcmp.ge.f32.partialorder %v1614_v47, 19.0  ;;  %v1795_v46 = vadd.f32 14.5, %v1600_v38 }
  0x95   : > { %v688_v41 = vsel %vm679_vm1, %v1391_v27, %v671_v37  ;;  %v468_v43 = vsel %vm459_vm12, %v1281_v39, %v451_v40  ;;  %vm544_vm7 = vcmp.ge.f32.partialorder %v1614_v47, 20.0  ;;  %vm561_vm6 = vcmp.ge.f32.partialorder %v1614_v47, 21.0 }
  0x96   : > { %698 = vst [vmem:[%s1404_s23 + $0x28] sm:$0xff] %v688_v41  ;;  %v485_v44 = vsel %vm476_vm14, %v1292_v42, %v468_v43  ;;  %vm239_vm13 = vcmp.ge.f32.partialorder %v1795_v46, 2.0  ;;  %vm256_vm8 = vcmp.ge.f32.partialorder %v1795_v46, 3.0  ;;  %vm273_vm15 = vcmp.ge.f32.partialorder %v1795_v46, 4.0 }
  0x97   : > { %v502_v49 = vsel %vm493_vm4, %v1303_v45, %v485_v44  ;;  %vm578_vm5 = vcmp.ge.f32.partialorder %v1614_v47, 22.0  ;;  %v248_v38 = vsel %vm239_vm13, %v1156_v8, %v1151_v7  ;;  %vm290_vm9 = vcmp.ge.f32.partialorder %v1795_v46, 5.0 }
  0x98   : > { %v519_v50 = vsel %vm510_vm3, %v1314_v48, %v502_v49  ;;  %vm595_vm11 = vcmp.ge.f32.partialorder %v1614_v47, 23.0  ;;  %v265_v55 = vsel %vm256_vm8, %v1167_v12, %v248_v38  ;;  %vm307_vm0 = vcmp.ge.f32.partialorder %v1795_v46, 6.0 }
  0x99   : > { %v536_v52 = vsel %vm527_vm10, %v1323_v51, %v519_v50  ;;  %vm612_vm2 = vcmp.ge.f32.partialorder %v1614_v47, 24.0  ;;  %v282_v56 = vsel %vm273_vm15, %v1174_v14, %v265_v55  ;;  %vm324_vm1 = vcmp.ge.f32.partialorder %v1795_v46, 7.0 }
  0x9a   : > { %v553_v53 = vsel %vm544_vm7, %v1331_v54, %v536_v52  ;;  %vm629_vm12 = vcmp.ge.f32.partialorder %v1614_v47, 25.0  ;;  %v299_v8 = vsel %vm290_vm9, %v1181_v16, %v282_v56  ;;  %vm341_vm14 = vcmp.ge.f32.partialorder %v1795_v46, 8.0 }
  0x9b   : > { %v570_v9 = vsel %vm561_vm6, %v1339_v57, %v553_v53  ;;  %vm646_vm4 = vcmp.ge.f32.partialorder %v1614_v47, 26.0  ;;  %v316_v59 = vsel %vm307_vm0, %v1188_v18, %v299_v8  ;;  %vm358_vm3 = vcmp.ge.f32.partialorder %v1795_v46, 9.0 }
  0x9c   : > { %v587_v7 = vsel %vm578_vm5, %v1347_v60, %v570_v9  ;;  %vm663_vm10 = vcmp.ge.f32.partialorder %v1614_v47, 27.0  ;;  %v333_v58 = vsel %vm324_vm1, %v1197_v20, %v316_v59  ;;  %vm375_vm7 = vcmp.ge.f32.partialorder %v1795_v46, 10.0 }
  0x9d   : > { %v604_v12 = vsel %vm595_vm11, %v1355_v63, %v587_v7  ;;  %vm680_vm6 = vcmp.ge.f32.partialorder %v1614_v47, 28.0  ;;  %v350_v61 = vsel %vm341_vm14, %v1207_v22, %v333_v58  ;;  %vm392_vm13 = vcmp.ge.f32.partialorder %v1795_v46, 11.0 }
  0x9e   : > { %v621_v14 = vsel %vm612_vm2, %v1363_v2, %v604_v12  ;;  %v367_v62 = vsel %vm358_vm3, %v1217_v24, %v350_v61  ;;  %vm409_vm8 = vcmp.ge.f32.partialorder %v1795_v46, 12.0  ;;  %vm426_vm15 = vcmp.ge.f32.partialorder %v1795_v46, 13.0 }
  0x9f   : > { %v638_v16 = vsel %vm629_vm12, %v1370_v6, %v621_v14  ;;  %v384_v20 = vsel %vm375_vm7, %v1227_v26, %v367_v62  ;;  %vm443_vm5 = vcmp.ge.f32.partialorder %v1795_v46, 14.0  ;;  %vm460_vm9 = vcmp.ge.f32.partialorder %v1795_v46, 15.0 }
  0xa0   : > { %v655_v18 = vsel %vm646_vm4, %v1377_v15, %v638_v16  ;;  %v401_v47 = vsel %vm392_vm13, %v1237_v28, %v384_v20  ;;  %vm477_vm11 = vcmp.ge.f32.partialorder %v1795_v46, 16.0  ;;  %vm494_vm0 = vcmp.ge.f32.partialorder %v1795_v46, 17.0 }
  0xa1   : > { %v672_v0 = vsel %vm663_vm10, %v1384_v21, %v655_v18  ;;  %v418_v22 = vsel %vm409_vm8, %v1247_v30, %v401_v47  ;;  %vm511_vm2 = vcmp.ge.f32.partialorder %v1795_v46, 18.0  ;;  %vm528_vm1 = vcmp.ge.f32.partialorder %v1795_v46, 19.0 }
  0xa2   : > { %v689_v1 = vsel %vm680_vm6, %v1391_v27, %v672_v0  ;;  %v435_v24 = vsel %vm426_vm15, %v1259_v33, %v418_v22  ;;  %vm545_vm12 = vcmp.ge.f32.partialorder %v1795_v46, 20.0  ;;  %vm562_vm14 = vcmp.ge.f32.partialorder %v1795_v46, 21.0 }
  0xa3   : > { %699 = vst [vmem:[%s1404_s23 + $0x30] sm:$0xff] %v689_v1  ;;  %v452_v26 = vsel %vm443_vm5, %v1270_v36, %v435_v24  ;;  %vm579_vm4 = vcmp.ge.f32.partialorder %v1795_v46, 22.0  ;;  %vm596_vm3 = vcmp.ge.f32.partialorder %v1795_v46, 23.0  ;;  %vm613_vm10 = vcmp.ge.f32.partialorder %v1795_v46, 24.0 }
  0xa4   : > { %v469_v3 = vsel %vm460_vm9, %v1281_v39, %v452_v26  ;;  %vm630_vm7 = vcmp.ge.f32.partialorder %v1795_v46, 25.0  ;;  %vm647_vm6 = vcmp.ge.f32.partialorder %v1795_v46, 26.0  ;;  %vm664_vm13 = vcmp.ge.f32.partialorder %v1795_v46, 27.0 }
  0xa5   : > { %v486_v28 = vsel %vm477_vm11, %v1292_v42, %v469_v3  ;;  %vm681_vm8 = vcmp.ge.f32.partialorder %v1795_v46, 28.0 }
  0xa6   : > { %v503_v30 = vsel %vm494_vm0, %v1303_v45, %v486_v28 }
  0xa7   : > { %v520_v33 = vsel %vm511_vm2, %v1314_v48, %v503_v30 }
  0xa8   : > { %v537_v36 = vsel %vm528_vm1, %v1323_v51, %v520_v33 }
  0xa9   : > { %v554_v39 = vsel %vm545_vm12, %v1331_v54, %v537_v36 }
  0xaa   : > { %v571_v42 = vsel %vm562_vm14, %v1339_v57, %v554_v39 }
  0xab   : > { %v588_v45 = vsel %vm579_vm4, %v1347_v60, %v571_v42 }
  0xac   : > { %v605_v48 = vsel %vm596_vm3, %v1355_v63, %v588_v45 }
  0xad   : > { %v622_v51 = vsel %vm613_vm10, %v1363_v2, %v605_v48 }
  0xae   : > { %v639_v54 = vsel %vm630_vm7, %v1370_v6, %v622_v51 }
  0xaf   : > { %v656_v57 = vsel %vm647_vm6, %v1377_v15, %v639_v54 }
  0xb0   : > { %v673_v60 = vsel %vm664_vm13, %v1384_v21, %v656_v57 }
  0xb1   : > { %v690_v63 = vsel %vm681_vm8, %v1391_v27, %v673_v60 }
  0xb2   : > { %700 = vst [vmem:[%s1404_s23 + $0x38] sm:$0xff] %v690_v63 }
  0xb3   : > { %975 = shalt.err (!%p972_p11)
}
  0xb4   : > { %852 = dma.vmem_to_hbm [thread:$0]  (%p1102_p3), %s716_s13, 1024, %s718_s30, %s702_s20  }
  0xb5 PF: > { %s729_s27 = sand.u32 1, %s1006_s9   ;;  %p1917_p12 = scmp.ge.s32.totalorder %s1018_s12, 2 }
  0xb6   : > { %s730_s17 = scalar_lea.sflag [#allocation4], %s729_s27 }
  0xb7   : > { %p863_p13 = pnand %p1917_p12, %p1071_p6 }
  0xb9   : > { %p864_p0 = pneg %p863_p13 }
  0xbb   : > { %1001 = dma.done.wait (%p864_p0), %s730_s17, 1024  }
  0xbc   : > { %1003 = vsyncadd (%p864_p0), %s730_s17, 4294966272  ;;  %p16_p5 = scmp.ge.s32.totalorder %s1087_s21, 4   ;;  %s1918_s9 = smov %s1010_s10 }
  0xbd   : > { %s1919_s10 = smov %s1014_s11  ;;  %s1920_s11 = smov %s1097_s25 }
  0xbe   : > { %s1921_s12 = smov %s1087_s21  ;;  %18 = sbr.rel (!%p16_p5) target bundleno = 6 (0x6), region = 80 }
  0xc3   :  { %736 = vsyncpa [#allocation3], 1 }
  0xc4   :  { %738 = vsyncpa [#allocation3 + $0x1], 1 }
  0xc5   :  { %739 = vsyncpa [#allocation4], 1 }
  0xc6   :  { %741 = vsyncpa [#allocation4 + $0x1], 1 }
  0xc7   :  { %742 = vsyncpa [#allocation5], 1 }
  0xc8   :  { %744 = vsyncpa [#allocation5 + $0x1], 1 }

</bundles_post_ra>
